<compile_context>
chip_gen: v7x
topology: tpu7x:2x2x1
jax: 0.10.0
libtpu: 0.0.40
codegen_flags: <defaults>
</compile_context>

<pallas_src>
import math

import jax
import jax.numpy as jnp
from jax.experimental import pallas as pl
from jax.experimental.pallas import tpu as pltpu


def _add_pe_kernel(x_ref, pe_ref, o_ref):
    # Fast path: x and pe blocks have identical shapes (1, R, L) -> plain add.
    # Fallback path: x (B, T) + pe (1, T) -> cheap sublane broadcast add.
    o_ref[...] = x_ref[...] + pe_ref[...]


def _sublane_pack(itemsize):
    # f32 -> 8 sublanes per vreg tile, bf16 -> 16, int8 -> 32.
    return max(8, 32 // itemsize)


def _choose_lane(s, pack, max_lane=2048):
    """Largest multiple of 128 that divides s (<= max_lane), preferring s//lane >= pack."""
    candidates = [l for l in range(128, min(max_lane, s) + 1, 128) if s % l == 0]
    good = [l for l in candidates if s // l >= pack]
    return max(good) if good else max(candidates)


def _choose_rows(r_total, lane, itemsize, target_block_bytes, pack, min_row_tiles=4):
    """Rows per block: multiple of `pack`, ~target_block_bytes, >= min_row_tiles tiles if possible."""
    bytes_per_row = lane * itemsize
    rows = max(pack, (target_block_bytes // bytes_per_row) // pack * pack)
    if r_total >= min_row_tiles * pack:
        # Keep at least `min_row_tiles` row tiles so the "parallel" axis can be
        # split across v7x's two TensorCores.
        rows = min(rows, max(pack, (r_total // min_row_tiles) // pack * pack))
    if rows >= r_total:
        rows = r_total  # full-extent block (always a legal block shape)
    return rows


def position_embedding_3d(x, position_embeddings, *, target_block_bytes=2 << 20):
    """x: (B, C, D, H, W); position_embeddings: (1, C, D, H, W). Returns x + pe."""
    B = x.shape[0]
    assert position_embeddings.shape == (1,) + x.shape[1:]

    S = math.prod(x.shape[1:])
    itemsize = jnp.dtype(x.dtype).itemsize
    pack = _sublane_pack(itemsize)

    if S % 128 == 0:
        # ---- Fast path: sublane + lane dense (1, R, L) blocks --------------
        lane = _choose_lane(S, pack)
        r_total = S // lane
        rows = _choose_rows(r_total, lane, itemsize, target_block_bytes, pack)
        n_row_tiles = pl.cdiv(r_total, rows)

        x3 = x.reshape(B, r_total, lane)          # free: contiguous re-fold
        pe3 = position_embeddings.reshape(1, r_total, lane)

        block_bytes = rows * lane * itemsize
        # Double-buffered x, pe and out blocks + headroom.
        vmem_limit = int(6 * block_bytes + (4 << 20))

        out3 = pl.pallas_call(
            _add_pe_kernel,
            out_shape=jax.ShapeDtypeStruct((B, r_total, lane), x.dtype),
            grid_spec=pltpu.PrefetchScalarGridSpec(
                num_scalar_prefetch=0,
                # Batch innermost: PE block index is constant across the inner
                # batch loop -> Pallas skips the PE re-DMA.
                grid=(n_row_tiles, B),
                in_specs=[
                    pl.BlockSpec((1, rows, lane), lambda r, b: (b, r, 0)),
                    pl.BlockSpec((1, rows, lane), lambda r, b: (0, r, 0)),
                ],
                out_specs=pl.BlockSpec((1, rows, lane), lambda r, b: (b, r, 0)),
            ),
            compiler_params=pltpu.CompilerParams(
                # Split the row-tile axis across TensorCores (keeps total PE
                # traffic at 1x); batch loop stays sequential.
                dimension_semantics=("parallel", "arbitrary"),
                vmem_limit_bytes=vmem_limit,
            ),
        )(x3, pe3)
        return out3.reshape(x.shape)

    # ---- Fallback path: S not a multiple of 128 ---------------------------
    # No wrapper-side pad/slice: the last (partial) block is handled in-kernel
    # by the cdiv grid with masked edge DMAs.
    x2 = x.reshape(B, S)
    pe2 = position_embeddings.reshape(1, S)

    if S < 128:
        tile = S  # full-extent last dim is a legal block shape
    else:
        tile = max(128, (target_block_bytes // (B * itemsize)) // 128 * 128)
        tile = min(tile, pl.cdiv(S, 128) * 128)
    n_tiles = pl.cdiv(S, tile)

    vmem_limit = int(2 * (2 * B + 1) * tile * itemsize + (4 << 20))

    out2 = pl.pallas_call(
        _add_pe_kernel,
        out_shape=jax.ShapeDtypeStruct((B, S), x.dtype),
        grid_spec=pltpu.PrefetchScalarGridSpec(
            num_scalar_prefetch=0,
            grid=(n_tiles,),
            in_specs=[
                pl.BlockSpec((B, tile), lambda s: (0, s)),
                pl.BlockSpec((1, tile), lambda s: (0, s)),
            ],
            out_specs=pl.BlockSpec((B, tile), lambda s: (0, s)),
        ),
        compiler_params=pltpu.CompilerParams(
            dimension_semantics=("parallel",),
            vmem_limit_bytes=vmem_limit,
        ),
    )(x2, pe2)
    return out2.reshape(x.shape)


if __name__ == "__main__":
    # Small shapes consistent with the module: channels=4, depth=4, height=8, width=16.
    B, C, D, H, W = 2, 4, 4, 8, 16

    key = jax.random.PRNGKey(0)
    kx, kpe = jax.random.split(key)

    x = jax.random.normal(kx, (B, C, D, H, W), dtype=jnp.float32)
    # Deterministic "randn" init of the parameter (nn.Parameter(torch.randn(1,C,D,H,W))).
    position_embeddings = jax.random.normal(kpe, (1, C, D, H, W), dtype=jnp.float32)

    out = position_embedding_3d(x, position_embeddings)
    out = jax.block_until_ready(out)

    # Correctness check against the plain-JAX reference (broadcast add).
    ref = x + position_embeddings
    assert out.shape == x.shape
    assert jnp.allclose(out, ref, atol=1e-6), "mismatch vs reference"

    print("KERNEL_OK")
</pallas_src>

<mosaic_0001>
module attributes {stable_mosaic.version = 11 : i64} {
  func.func @_add_pe_kernel(%arg0: i32, %arg1: i32, %arg2: memref<1x8x256xf32, #tpu.memory_space<vmem>>, %arg3: memref<1x8x256xf32, #tpu.memory_space<vmem>>, %arg4: memref<1x8x256xf32, #tpu.memory_space<vmem>>) attributes {dimension_semantics = [#tpu.dimension_semantics<parallel>, #tpu.dimension_semantics<arbitrary>], iteration_bounds = array<i64: 1, 2>, scalar_prefetch = 0 : i64, scratch_operands = 0 : i64, tpu.core_type = #tpu.core_type<tc>, window_params = [{transform_indices = @transform_0, window_bounds = array<i64: 1, 8, 256>}, {transform_indices = @transform_1, window_bounds = array<i64: 1, 8, 256>}, {transform_indices = @transform_2, window_bounds = array<i64: 1, 8, 256>}]} {
    %c0 = arith.constant 0 : index
    %c0_0 = arith.constant 0 : index
    %c0_1 = arith.constant 0 : index
    %0 = vector.load %arg2[%c0, %c0_0, %c0_1] : memref<1x8x256xf32, #tpu.memory_space<vmem>>, vector<1x8x256xf32>
    %c0_2 = arith.constant 0 : index
    %c0_3 = arith.constant 0 : index
    %c0_4 = arith.constant 0 : index
    %1 = vector.load %arg3[%c0_2, %c0_3, %c0_4] : memref<1x8x256xf32, #tpu.memory_space<vmem>>, vector<1x8x256xf32>
    %2 = arith.addf %0, %1 : vector<1x8x256xf32>
    %c0_5 = arith.constant 0 : index
    %c0_6 = arith.constant 0 : index
    %c0_7 = arith.constant 0 : index
    %3 = vector.load %arg4[%c0_5, %c0_6, %c0_7] : memref<1x8x256xf32, #tpu.memory_space<vmem>>, vector<1x8x256xf32>
    tpu.vector_store %arg4[%c0_5, %c0_6, %c0_7], %2 {strides = array<i32>} : memref<1x8x256xf32, #tpu.memory_space<vmem>>, vector<1x8x256xf32>,
    return
  }
  func.func @transform_0(%arg0: i32, %arg1: i32) -> (i32, i32, i32) {
    %c0_i32 = arith.constant 0 : i32
    %c0_i32_0 = arith.constant 0 : i32
    return %arg1, %arg0, %c0_i32 : i32, i32, i32
  }
  func.func @transform_1(%arg0: i32, %arg1: i32) -> (i32, i32, i32) {
    %c0_i32 = arith.constant 0 : i32
    %c0_i32_0 = arith.constant 0 : i32
    %c0_i32_1 = arith.constant 0 : i32
    return %c0_i32, %arg0, %c0_i32_0 : i32, i32, i32
  }
  func.func @transform_2(%arg0: i32, %arg1: i32) -> (i32, i32, i32) {
    %c0_i32 = arith.constant 0 : i32
    %c0_i32_0 = arith.constant 0 : i32
    return %arg1, %arg0, %c0_i32 : i32, i32, i32
  }
}

</mosaic_0001>

<bundles_post_ra>
// kernel: tpu_custom_call.1
= control target key start
LH: loop header
LB: loop body
LE: loop exit
PB: predicated region body
PF: predicated region fallthrough
CT: control target
= control target key end

     0   :  { %7 = vsyncpa [#allocation3], 0  ;;  %s792_s0 = inlined_call_operand.hbm [shape: f32[2,8,256], index: 0, kind: input, shape index: {}]   ;;  %s793_s1 = inlined_call_operand.hbm [shape: f32[1,8,256], index: 1, kind: input, shape index: {}]   ;;  %s794_s2 = inlined_call_operand.hbm [shape: f32[2,8,256], index: 2, kind: output, shape index: {}]  }
   0x1   :  { %9 = vsyncpa [#allocation3 + $0x1], 0 }
   0x2   :  { %10 = vsyncpa [#allocation6], 0 }
   0x3   :  { %11 = vsyncpa [#allocation4], 0 }
   0x4   :  { %13 = vsyncpa [#allocation4 + $0x1], 0  ;;  %s576_s9 = smov 0   ;;  %s578_s10 = smov 0  }
   0x5   :  { %s580_s11 = smov 0   ;;  %s582_s12 = smov 0  }
   0x6   :  { %s584_s13 = smov 0   ;;  %s586_s14 = smov 0  }
   0x7 LB: > { %s320_s15 = sadd.s32 4294967295, %s556_s14   ;;  %s321_s16 = sadd.s32 4294967294, %s556_s14   ;;  %s556_s14 = sphi %s586_s14, %s19_s14   ;;  %s552_s13 = sphi %s584_s13, %s819_s13   ;;  %s548_s12 = sphi %s582_s12, %s818_s12   ;;  %s544_s11 = sphi %s580_s11, %s817_s11   ;;  %s540_s10 = sphi %s578_s10, %s816_s10   ;;  %s536_s9 = sphi %s576_s9, %s815_s9  }
   0x8   : > { %p53_p0 = scmp.ne.s32.totalorder %s540_s10, %s536_s9  ;;  %p610_p1 = scmp.eq.s32.totalorder %s320_s15, 0 }
   0x9   : > { %p614_p2 = scmp.eq.s32.totalorder %s320_s15, 1  ;;  %p111_p3 = scmp.eq.s32.totalorder %s321_s16, 1 }
   0xa   : > { %s799_s17 = scalar_select %p610_p1, 1, 0 }
   0xb   : > { %s800_s18 = scalar_select %p614_p2, 1, 0 }
   0xc   : > { %p620_p4 = por %p610_p1, %p53_p0  ;;  %p322_p5 = scmp.ge.s32.totalorder %s556_s14, 1 }
   0xd   : > { %p625_p6 = por %p111_p3, %p53_p0  ;;  %p118_p7 = scmp.lt.s32.totalorder %s556_s14, 3 }
   0xe   : > { %s801_s19 = scalar_select %p620_p4, 1, 0 }
   0xf   : > { %s802_s20 = scalar_select %p625_p6, 1, 0 }
  0x10   : > { %p630_p8 = pnand %p322_p5, %p118_p7  ;;  %s558_s22 = smov [#allocation5]  }
  0x11   : > { %s134_s23 = sshll.u32 %s558_s22, 4  ;;  %s28_s25 = sadd.s32 1, %s552_s13  ;;  %s135_s23 = int_to_ptr.vmem [resolvable:$true] %s134_s23 }
  0x12   : > { %s803_s21 = scalar_select %p630_p8, 1, 0 }
  0x13   : > { %p347_p10 = pneg %p630_p8  ;;  %s40_s26 = sadd.s32 1, %s544_s11 }
  0x14   : > { %p645_p12 = scmp.ge.s32.totalorder %s28_s25, 2  ;;  %s412_s30 = scalar_lea.hbm %s793_s1, 256 }
  0x15   : > { %p639_p11 = pnand %p347_p10, %p610_p1  ;;  %p413_p13 = scmp.ne.s32.totalorder %s793_s1, %s412_s30 }
  0x16   : > { %s805_s27 = scalar_select %p645_p12, 1, 0 }
  0x17   : > { %p414_p0 = pneg %p639_p11  ;;  %p419_p7 = scmp.lt.u32.totalorder %s412_s30, %s793_s1 }
  0x19   : > { %p415_p3 = pnand %p414_p0, %p413_p13 }
  0x1b   : > { %p416_p5 = pneg %p415_p3 }
  0x1d   : > { %p421_p10 = pnand %p419_p7, %p416_p5 }
  0x1f   : > { %424 = shalt.err (!%p421_p10)
}
  0x20   : > { %s425_s7 = scalar_lea.vmem %s135_s23, 256  ;;  %p433_p4 = scmp.lt.s32.totalorder %s135_s23, %s135_s23 }
  0x21   : > { %p426_p9 = scmp.ne.s32.totalorder %s135_s23, %s425_s7  ;;  %p434_p8 = scmp.lt.s32.totalorder %s425_s7, %s425_s7 }
  0x23   : > { %p428_p6 = pnand %p426_p9, %p414_p0  ;;  %p435_p2 = por %p434_p8, %p433_p4 }
  0x25   : > { %p429_p1 = pneg %p428_p6 }
  0x27   : > { %p436_p12 = pnand %p435_p2, %p429_p1 }
  0x29   : > { %439 = shalt.err (!%p436_p12)
}
  0x2a   : > { %350 = dma.hbm_to_vmem [thread:$0]  (!%p639_p11), %s793_s1, 256, %s135_s23, [#allocation6]  }
  0x2b   : > { %p806_p4 = scmp.ne.s32.totalorder %s805_s27, 0  ;;  %p47_p1 = scmp.ne.s32.totalorder %s544_s11, %s540_s10 }
  0x2c   : > { %p48_p2 = scmp.eq.s32.totalorder %s556_s14, 0  ;;  %p360_p6 = scmp.lt.s32.totalorder %s556_s14, 2 }
  0x2d   : > { %s821_s25 = smov (%p806_p4, %s28_s25), 0  ;;  %p807_p12 = scmp.ne.s32.totalorder %s800_s18, 0 }
  0x2e   : > { %s35_s16 = ssub.s32 %s552_s13, %s821_s25  ;;  %p49_p9 = por %p48_p2, %p47_p1 }
  0x2f   : > { %p38_p8 = scmp.eq.s32.totalorder %s35_s16, 0  ;;  %p677_p13 = por %p807_p12, %p47_p1 }
  0x30   : > { %s145_s24 = sand.u32 1, %s544_s11   ;;  %s337_s27 = sshll.u32 %s552_s13, 8 }
  0x31   : > { %s685_s28 = scalar_select %p38_p8, %s544_s11, %s40_s26  }
  0x32   : > { %s325_s23 = sshll.u32 %s145_s24, 4  ;;  %s691_s3 = scalar_lea.hbm %s792_s0, %s337_s27 }
  0x33   : > { %s149_s18 = scalar_lea.vmem [#allocation2], %s325_s23  ;;  %p695_p11 = pnand %p360_p6, %p49_p9 }
  0x34   : > { %s159_s4 = sshll.u32 %s149_s18, 4  ;;  %s146_s26 = scalar_lea.sflag [#allocation3], %s145_s24  ;;  %s693_s4 = int_to_ptr.vmem [resolvable:$true] %s159_s4 }
  0x35   : > { %s440_s6 = scalar_lea.hbm %s691_s3, 256  ;;  %p442_p3 = pneg %p695_p11 }
  0x36   : > { %p441_p0 = scmp.ne.s32.totalorder %s691_s3, %s440_s6  ;;  %s445_s15 = scalar_lea.hbm %s792_s0, 512 }
  0x37   : > { %p446_p10 = scmp.lt.u32.totalorder %s691_s3, %s792_s0  ;;  %p447_p4 = scmp.lt.u32.totalorder %s445_s15, %s440_s6 }
  0x38   : > { %p443_p5 = pnand %p442_p3, %p441_p0  ;;  %p449_p2 = scmp.lt.u32.totalorder %s440_s6, %s691_s3 }
  0x39   : > { %p448_p1 = por %p447_p4, %p446_p10 }
  0x3a   : > { %p444_p7 = pneg %p443_p5 }
  0x3b   : > { %p450_p6 = por %p449_p2, %p448_p1 }
  0x3d   : > { %p451_p8 = pnand %p450_p6, %p444_p7 }
  0x3f   : > { %454 = shalt.err (!%p451_p8)
}
  0x40   : > { %s455_s24 = scalar_lea.vmem %s693_s4, 256  ;;  %s559_s27 = smov [#allocation2]  }
  0x41   : > { %p456_p9 = scmp.ne.s32.totalorder %s693_s4, %s455_s24  ;;  %s460_s29 = sshll.u32 %s559_s27, 4  ;;  %s461_s29 = int_to_ptr.vmem [resolvable:$false] %s460_s29 }
  0x42   : > { %s462_s30 = scalar_lea.vmem %s461_s29, 512  ;;  %p463_p5 = scmp.lt.s32.totalorder %s693_s4, %s461_s29 }
  0x43   : > { %p458_p12 = pnand %p456_p9, %p442_p3  ;;  %p464_p10 = scmp.lt.s32.totalorder %s462_s30, %s455_s24 }
  0x45   : > { %p459_p0 = pneg %p458_p12  ;;  %p465_p4 = por %p464_p10, %p463_p5 }
  0x47   : > { %p466_p1 = pnand %p465_p4, %p459_p0 }
  0x49   : > { %469 = shalt.err (!%p466_p1)
}
  0x4a   : > { %354 = dma.hbm_to_vmem [thread:$0]  (!%p695_p11), %s691_s3, 256, %s693_s4, %s146_s26  }
  0x4b   : > { %p810_p7 = scmp.ne.s32.totalorder %s803_s21, 0 }
  0x4c   : > { %s727_s18 = sand.u32 (!%p810_p7), 1, %s540_s10   ;;  %p811_p3 = scmp.ne.s32.totalorder (!%p810_p7), %s801_s19, 0 }
  0x4d   : > { %168 = sbr.rel (%p810_p7) target bundleno = 113 (0x71), region = 28  ;;  %s329_s6 = sshll.u32 (!%p810_p7), %s727_s18, 4 }
  0x4e   : > { %s171_s7 = scalar_lea.sflag (!%p810_p7), [#allocation3], %s727_s18  ;;  %s174_s8 = scalar_lea.vmem (!%p810_p7), [#allocation2], %s329_s6 }
  0x54   : > { %523 = dma.done.wait (%p811_p3), %s171_s7, 256  }
  0x55   : > { %525 = vsyncadd (%p811_p3), %s171_s7, 4294967040  ;;  %p812_p2 = scmp.ne.s32.totalorder %s799_s17, 0 }
  0x57   : > { %527 = dma.done.wait (%p812_p2), [#allocation6], 256  }
  0x58   : > { %529 = vsyncadd (%p812_p2), [#allocation6], 4294967040  ;;  %s198_s21 = scalar_lea.vmem [#allocation7], %s329_s6  ;;  %s338_s4 = sshll.u32 %s548_s12, 8  ;;  %v199_v0 = vld [vmem:[%s174_s8] sm:$0xff]  ;;  %v200_v2 = vld [vmem:[%s174_s8 + $0x8] sm:$0xff] }
  0x59   : > { %s224_s3 = sshll.u32 %s198_s21, 4  ;;  %v201_v1 = vld [vmem:[#allocation5] sm:$0xff]  ;;  %v202_v4 = vld [vmem:[#allocation5 + $0x8] sm:$0xff]  ;;  %s745_s5 = scalar_lea.hbm %s794_s2, %s338_s4  ;;  %s740_s3 = int_to_ptr.vmem [resolvable:$true] %s224_s3 }
  0x5a   : > { %v203_v3 = vadd.f32 %v201_v1, %v199_v0  ;;  %v204_v5 = vadd.f32 %v202_v4, %v200_v2  ;;  %s208_s26 = scalar_lea.sflag [#allocation4], %s727_s18  ;;  %s470_s12 = scalar_lea.vmem %s740_s3, 256 }
  0x5b   : > { %p471_p11 = scmp.ne.s32.totalorder %s740_s3, %s470_s12  ;;  %s560_s15 = smov [#allocation7]  }
  0x5c   : > { %205 = vst [vmem:[%s198_s21] sm:$0xff] %v203_v3  ;;  %206 = vst [vmem:[%s198_s21 + $0x8] sm:$0xff] %v204_v5  ;;  %s474_s16 = sshll.u32 %s560_s15, 4  ;;  %s475_s16 = int_to_ptr.vmem [resolvable:$false] %s474_s16 }
  0x5d   : > { %p472_p6 = pnand %p471_p11, %p677_p13  ;;  %s476_s23 = scalar_lea.vmem %s475_s16, 512 }
  0x5e   : > { %p477_p9 = scmp.lt.s32.totalorder %s740_s3, %s475_s16  ;;  %p478_p12 = scmp.lt.s32.totalorder %s476_s23, %s470_s12 }
  0x5f   : > { %p473_p8 = pneg %p472_p6 }
  0x60   : > { %p479_p0 = por %p478_p12, %p477_p9 }
  0x62   : > { %p480_p5 = pnand %p479_p0, %p473_p8 }
  0x64   : > { %483 = shalt.err (!%p480_p5)
}
  0x65   : > { %s484_s24 = scalar_lea.hbm %s745_s5, 256  ;;  %s488_s30 = scalar_lea.hbm %s794_s2, 512 }
  0x66   : > { %p485_p10 = scmp.ne.s32.totalorder %s745_s5, %s484_s24  ;;  %p489_p7 = scmp.lt.u32.totalorder %s745_s5, %s794_s2 }
  0x67   : > { %p490_p3 = scmp.lt.u32.totalorder %s488_s30, %s484_s24  ;;  %p492_p11 = scmp.lt.u32.totalorder %s484_s24, %s745_s5 }
  0x68   : > { %p486_p4 = pnand %p485_p10, %p677_p13 }
  0x69   : > { %p491_p2 = por %p490_p3, %p489_p7 }
  0x6a   : > { %p487_p1 = pneg %p486_p4 }
  0x6b   : > { %p493_p6 = por %p492_p11, %p491_p2 }
  0x6d   : > { %p494_p8 = pnand %p493_p6, %p487_p1 }
  0x6f   : > { %497 = shalt.err (!%p494_p8)
}
  0x70   : > { %345 = dma.vmem_to_hbm [thread:$0]  (%p677_p13), %s740_s3, 256, %s745_s5, %s208_s26  }
  0x71 PF: > { %s236_s7 = sand.u32 1, %s536_s9   ;;  %p813_p9 = scmp.ne.s32.totalorder %s802_s20, 0 }
  0x72   : > { %p814_p12 = scmp.ge.s32.totalorder %s556_s14, 2  ;;  %s237_s8 = scalar_lea.sflag [#allocation4], %s236_s7 }
  0x74   : > { %p356_p0 = pnand %p814_p12, %p813_p9 }
  0x76   : > { %531 = dma.done.wait (!%p356_p0), %s237_s8, 256  }
  0x77   : > { %533 = vsyncadd (!%p356_p0), %s237_s8, 4294967040  ;;  %s19_s14 = sadd.s32 1, %s556_s14   ;;  %s815_s9 = smov %s540_s10 }
  0x78   : > { %p16_p5 = scmp.ge.s32.totalorder %s19_s14, 4   ;;  %s816_s10 = smov %s544_s11 }
  0x79   : > { %s817_s11 = smov %s685_s28  ;;  %s818_s12 = smov %s552_s13 }
  0x7a   : > { %s819_s13 = smov %s821_s25  ;;  %18 = sbr.rel (!%p16_p5) target bundleno = 7 (0x7), region = 78 }
  0x81   :  { %242 = vsyncpa [#allocation3], 1 }
  0x82   :  { %244 = vsyncpa [#allocation3 + $0x1], 1 }
  0x83   :  { %245 = vsyncpa [#allocation6], 1 }
  0x84   :  { %246 = vsyncpa [#allocation4], 1 }
  0x85   :  { %248 = vsyncpa [#allocation4 + $0x1], 1 }

</bundles_post_ra>
